<compile_context>
chip_gen: v7x
topology: tpu7x:2x2x1
jax: 0.10.0
libtpu: 0.0.40
codegen_flags: <defaults>
</compile_context>

<pallas_src>
import functools

import jax
import jax.numpy as jnp
from jax.experimental import pallas as pl
from jax.experimental.pallas import tpu as pltpu


def _round_up(x, m):
    return (x + m - 1) // m * m


def _vmem_budget_bytes():
    """7/8 of per-core VMEM: ~56 MiB on v7x, ~112 MiB on v5e/v6e."""
    cap = 64 * 1024 * 1024
    try:
        info = pltpu.get_tpu_info()
        c = getattr(info, "vmem_capacity_bytes", None)
        if c:
            cap = int(c)
    except Exception:
        pass
    return cap - cap // 8


def fold_context_gating_params(w, b, bn_gamma=None, bn_beta=None, bn_mean=None,
                               bn_var=None, *, eps=1e-5,
                               weight_dtype=jnp.bfloat16):
    """One-time parameter folding (do at model-load time, NOT per call).

    w: (D, D) nn.Linear weight (out, in); b: (D,) bias. Returns
        w_folded = W^T * bn_scale                       (D_in, D_out), weight_dtype
        shift    = bn_scale*b + beta - mean*bn_scale    (1, D_out),    f32
    so the kernel computes  x @ w_folded + shift == BN(Linear(x)).
    """
    D = w.shape[0]
    if bn_gamma is None:                                  # add_batch_norm=False
        scale = jnp.ones((D,), jnp.float32)
        shift = b.astype(jnp.float32)
    else:
        scale = bn_gamma / jnp.sqrt(bn_var + eps)
        shift = scale * b + bn_beta - bn_mean * scale
    w_folded = (w.T.astype(jnp.float32) * scale[None, :]).astype(weight_dtype)
    return w_folded, shift.reshape(1, D).astype(jnp.float32)


def _context_gating_kernel(x_ref, w_ref, shift_ref, o_ref, *,
                           cast_dtype, tile_n, nn):
    # x_ref    : (tile_b, D)      full-feature rows (matmul AND gate operand)
    # w_ref    : (D, tile_n)      folded weight  W^T * bn_scale
    # shift_ref: (1, tile_n)      folded bias    bn_scale*b + beta - mean*bn_scale
    # o_ref    : (tile_b, tile_n)
    x = x_ref[...]
    xm = x.astype(cast_dtype) if cast_dtype is not None else x
    x1 = jnp.dot(xm, w_ref[...], preferred_element_type=jnp.float32)
    x1 = x1 + shift_ref[...]
    gate = jax.nn.sigmoid(x1)                             # EUP, f32
    # GLU(cat([x, x1], 1), 1) == x * sigmoid(x1); gate with the ORIGINAL x.
    if nn == 1:
        xg = x
    else:
        start = pl.multiple_of(pl.program_id(0) * tile_n, 128)
        xg = x_ref[:, pl.ds(start, tile_n)]
    o_ref[...] = (xg.astype(jnp.float32) * gate).astype(o_ref.dtype)


def context_gating(x, w_folded, shift, *, tile_b=256):
    """x: (B, D); (w_folded, shift) from fold_context_gating_params.  -> (B, D)."""
    B, D = x.shape
    assert w_folded.shape == (D, D) and shift.shape == (1, D)

    itm_w = jnp.dtype(w_folded.dtype).itemsize
    itm_x = jnp.dtype(x.dtype).itemsize
    budget = _vmem_budget_bytes()

    # ---- batch tile: 16-aligned for the bf16 matmul path; split so nb >= 2 ---
    align = 16 if itm_w < 4 else 8
    tile_b = _round_up(min(tile_b, _round_up(B, align)), align)
    if pl.cdiv(B, tile_b) < 2 and B > align:   # megacore: shard the batch axis
        tile_b = _round_up(pl.cdiv(B, 2), align)
    nb = pl.cdiv(B, tile_b)

    # ---- column stripe: largest 128-multiple divisor of D that fits VMEM -----
    def footprint(tn):
        return (2 * D * tn * itm_w              # weight stripe, double-buffered
                + 2 * tile_b * D * itm_x        # x block, double-buffered
                + 2 * tile_b * tn * itm_x       # output block
                + 2 * 8 * tn * 4)               # shift (sublane-padded)

    cands = sorted((n for n in range(128, D + 1, 128) if D % n == 0),
                   reverse=True) or [D]         # full-width fallback for odd D
    tile_n = next((n for n in cands if footprint(n) <= budget), cands[-1])
    nn = pl.cdiv(D, tile_n)

    vmem_limit = int(min(budget, max(32 * 1024 * 1024,
                                     footprint(tile_n) * 5 // 4)))

    cast_dtype = None if w_folded.dtype == x.dtype else w_folded.dtype
    kernel = functools.partial(_context_gating_kernel, cast_dtype=cast_dtype,
                               tile_n=tile_n, nn=nn)

    return pl.pallas_call(
        kernel,
        out_shape=jax.ShapeDtypeStruct((B, D), x.dtype),
        grid_spec=pltpu.PrefetchScalarGridSpec(
            num_scalar_prefetch=0,
            # column stripe OUTER, batch INNER: the weight block changes only
            # once per stripe; with nn == 1 it is DMA'd exactly once.
            grid=(nn, nb),
            in_specs=[
                pl.BlockSpec((tile_b, D), lambda j, i: (i, 0)),   # x
                pl.BlockSpec((D, tile_n), lambda j, i: (0, j)),   # folded weight
                pl.BlockSpec((1, tile_n), lambda j, i: (0, j)),   # folded shift
            ],
            out_specs=pl.BlockSpec((tile_b, tile_n), lambda j, i: (i, j)),
        ),
        compiler_params=pltpu.CompilerParams(
            dimension_semantics=("arbitrary", "parallel"),
            vmem_limit_bytes=vmem_limit),
    )(x, w_folded, shift)


if __name__ == "__main__":
    # Small shapes; B deliberately NOT a multiple of the batch tile / alignment.
    B, D = 50, 256
    key = jax.random.PRNGKey(0)
    k_x, k_w, k_b, k_g, k_be, k_m, k_v = jax.random.split(key, 7)

    x = jax.random.normal(k_x, (B, D), dtype=jnp.float32)
    # nn.Linear(D, D): weight (D_out, D_in), bias (D_out,)
    w = jax.random.normal(k_w, (D, D), dtype=jnp.float32) * (1.0 / jnp.sqrt(D))
    b = jax.random.normal(k_b, (D,), dtype=jnp.float32) * 0.1
    # BatchNorm1d(D) affine params / running stats (deterministic, non-trivial)
    bn_gamma = 1.0 + 0.1 * jax.random.normal(k_g, (D,), dtype=jnp.float32)
    bn_beta = 0.1 * jax.random.normal(k_be, (D,), dtype=jnp.float32)
    bn_mean = 0.1 * jax.random.normal(k_m, (D,), dtype=jnp.float32)
    bn_var = jnp.abs(1.0 + 0.1 * jax.random.normal(k_v, (D,), dtype=jnp.float32))

    # Pure-JAX reference (inference-mode BN), matches the PyTorch forward.
    eps = 1e-5
    x1_ref = x @ w.T + b
    x1_ref = (x1_ref - bn_mean) / jnp.sqrt(bn_var + eps) * bn_gamma + bn_beta
    ref = x * jax.nn.sigmoid(x1_ref)

    # --- f32 matmul path (tight-tolerance correctness check) ------------------
    wf32, shift32 = fold_context_gating_params(
        w, b, bn_gamma, bn_beta, bn_mean, bn_var, eps=eps,
        weight_dtype=jnp.float32)
    out_f32 = jax.block_until_ready(context_gating(x, wf32, shift32))
    assert out_f32.shape == (B, D)
    assert jnp.allclose(out_f32, ref, atol=2e-4, rtol=2e-4), "f32 mismatch vs reference"

    # --- bf16 matmul path (default; gate / epilogue stay f32) -----------------
    wbf16, shiftbf = fold_context_gating_params(
        w, b, bn_gamma, bn_beta, bn_mean, bn_var, eps=eps)   # weight_dtype=bf16
    out_bf16 = jax.block_until_ready(context_gating(x, wbf16, shiftbf))
    assert out_bf16.shape == (B, D)
    assert jnp.allclose(out_bf16, ref, atol=3e-2, rtol=3e-2), "bf16 mismatch vs reference"

    print("KERNEL_OK")
</pallas_src>

<mosaic_0001>
module attributes {stable_mosaic.version = 11 : i64} {
  func.func @_context_gating_kernel(%arg0: i32, %arg1: i32, %arg2: memref<32x256xf32, #tpu.memory_space<vmem>>, %arg3: memref<256x256xf32, #tpu.memory_space<vmem>>, %arg4: memref<1x256xf32, #tpu.memory_space<vmem>>, %arg5: memref<32x256xf32, #tpu.memory_space<vmem>>) attributes {dimension_semantics = [#tpu.dimension_semantics<arbitrary>, #tpu.dimension_semantics<parallel>], iteration_bounds = array<i64: 1, 2>, scalar_prefetch = 0 : i64, scratch_operands = 0 : i64, tpu.core_type = #tpu.core_type<tc>, window_params = [{transform_indices = @transform_0, window_bounds = array<i64: 32, 256>}, {transform_indices = @transform_1, window_bounds = array<i64: 256, 256>}, {transform_indices = @transform_2, window_bounds = array<i64: 1, 256>}, {transform_indices = @transform_3, window_bounds = array<i64: 32, 256>}]} {
    %c0 = arith.constant 0 : index
    %c0_0 = arith.constant 0 : index
    %0 = vector.load %arg2[%c0, %c0_0] : memref<32x256xf32, #tpu.memory_space<vmem>>, vector<32x256xf32>
    %c0_1 = arith.constant 0 : index
    %c0_2 = arith.constant 0 : index
    %1 = vector.load %arg3[%c0_1, %c0_2] : memref<256x256xf32, #tpu.memory_space<vmem>>, vector<256x256xf32>
    %cst = arith.constant dense<0.000000e+00> : vector<32x256xf32>
    %2 = tpu.matmul %0, %1, %cst {dimension_numbers = #tpu.dot_dimension_numbers<[1], [0], [0], [1], [0, 0, 1, 1], [], []>} : vector<32x256xf32>, vector<256x256xf32>, vector<32x256xf32> -> vector<32x256xf32>
    %c0_3 = arith.constant 0 : index
    %c0_4 = arith.constant 0 : index
    %3 = vector.load %arg4[%c0_3, %c0_4] : memref<1x256xf32, #tpu.memory_space<vmem>>, vector<1x256xf32>
    %4 = vector.broadcast %3 : vector<1x256xf32> to vector<32x256xf32>
    %5 = arith.addf %2, %4 : vector<32x256xf32>
    %6 = arith.negf %5 : vector<32x256xf32>
    %7 = math.exp %6 : vector<32x256xf32>
    %cst_5 = arith.constant 1.000000e+00 : f32
    %8 = vector.broadcast %cst_5 : f32 to vector<32x256xf32>
    %9 = arith.addf %8, %7 : vector<32x256xf32>
    %10 = arith.divf %8, %9 : vector<32x256xf32>
    %11 = arith.mulf %0, %10 : vector<32x256xf32>
    %c0_6 = arith.constant 0 : index
    %c0_7 = arith.constant 0 : index
    %12 = vector.load %arg5[%c0_6, %c0_7] : memref<32x256xf32, #tpu.memory_space<vmem>>, vector<32x256xf32>
    tpu.vector_store %arg5[%c0_6, %c0_7], %11 {strides = array<i32>} : memref<32x256xf32, #tpu.memory_space<vmem>>, vector<32x256xf32>,
    return
  }
  func.func @transform_0(%arg0: i32, %arg1: i32) -> (i32, i32) {
    %c0_i32 = arith.constant 0 : i32
    %c0_i32_0 = arith.constant 0 : i32
    return %arg1, %c0_i32 : i32, i32
  }
  func.func @transform_1(%arg0: i32, %arg1: i32) -> (i32, i32) {
    %c0_i32 = arith.constant 0 : i32
    %c0_i32_0 = arith.constant 0 : i32
    return %c0_i32, %arg0 : i32, i32
  }
  func.func @transform_2(%arg0: i32, %arg1: i32) -> (i32, i32) {
    %c0_i32 = arith.constant 0 : i32
    %c0_i32_0 = arith.constant 0 : i32
    return %c0_i32, %arg0 : i32, i32
  }
  func.func @transform_3(%arg0: i32, %arg1: i32) -> (i32, i32) {
    %c0_i32 = arith.constant 0 : i32
    return %arg1, %arg0 : i32, i32
  }
}

</mosaic_0001>

<bundles_post_ra>
// kernel: tpu_custom_call.1
= control target key start
LH: loop header
LB: loop body
LE: loop exit
PB: predicated region body
PF: predicated region fallthrough
CT: control target
= control target key end

     0   :  { %8 = vsyncpa [#allocation3], 0  ;;  %s1340_s0 = inlined_call_operand.hbm [shape: f32[50,256], index: 0, kind: input, shape index: {}]   ;;  %s1341_s1 = inlined_call_operand.hbm [shape: f32[256,256], index: 1, kind: input, shape index: {}]   ;;  %s1342_s2 = inlined_call_operand.vmem [shape: f32[1,256], index: 2, kind: input, shape index: {}]   ;;  %s1343_s3 = inlined_call_operand.hbm [shape: f32[50,256], index: 3, kind: output, shape index: {}]  }
   0x1   :  { %10 = vsyncpa [#allocation3 + $0x1], 0 }
   0x2   :  { %11 = vsyncpa [#allocation6], 0 }
   0x3   :  { %12 = vsyncpa [#allocation4], 0 }
   0x4   :  { %14 = vsyncpa [#allocation4 + $0x1], 0  ;;  %s1053_s12 = smov 0   ;;  %s1055_s13 = smov 0  }
   0x5   :  { %s1057_s14 = smov 0   ;;  %s1059_s15 = smov 0  }
   0x6   :  { %s1061_s16 = smov 0   ;;  %s1063_s17 = smov 0  }
   0x7 LB: > { %s636_s18 = sadd.s32 4294967295, %s1022_s17   ;;  %s637_s19 = sadd.s32 4294967294, %s1022_s17   ;;  %s1022_s17 = sphi %s1063_s17, %s20_s17   ;;  %s1018_s16 = sphi %s1061_s16, %s1365_s16   ;;  %s1014_s15 = sphi %s1059_s15, %s1364_s15   ;;  %s1010_s14 = sphi %s1057_s14, %s1363_s14   ;;  %s1006_s13 = sphi %s1055_s13, %s1362_s13   ;;  %s1002_s12 = sphi %s1053_s12, %s1361_s12  }
   0x8   : > { %s29_s20 = sadd.s32 1, %s1018_s16  ;;  %s39_s21 = sadd.s32 1, %s1010_s14 }
   0x9   : > { %p30_p0 = scmp.ge.s32.totalorder %s29_s20, 2  ;;  %p46_p1 = scmp.ne.s32.totalorder %s1010_s14, %s1006_s13 }
   0xa   : > { %p47_p2 = scmp.eq.s32.totalorder %s1022_s17, 0  ;;  %p52_p3 = scmp.ne.s32.totalorder %s1006_s13, %s1002_s12 }
   0xb   : > { %s1367_s20 = smov (%p30_p0, %s29_s20), 0  ;;  %p1098_p5 = scmp.eq.s32.totalorder %s636_s18, 0 }
   0xc   : > { %p1094_p4 = por %p47_p2, %p46_p1  ;;  %s36_s24 = ssub.s32 %s1018_s16, %s1367_s20 }
   0xd   : > { %s1349_s23 = scalar_select %p1098_p5, 1, 0 }
   0xe   : > { %s1348_s22 = scalar_select %p1094_p4, 1, 0 }
   0xf   : > { %p130_p6 = scmp.eq.s32.totalorder %s636_s18, 1  ;;  %p37_p7 = scmp.eq.s32.totalorder %s36_s24, 0 }
  0x10   : > { %p1106_p8 = por %p1098_p5, %p52_p3  ;;  %p136_p10 = scmp.eq.s32.totalorder %s637_s19, 1 }
  0x11   : > { %p1110_p9 = por %p130_p6, %p46_p1  ;;  %p638_p12 = scmp.ge.s32.totalorder %s1022_s17, 1 }
  0x12   : > { %s1350_s25 = scalar_select %p1106_p8, 1, 0 }
  0x13   : > { %s1351_s26 = scalar_select %p1110_p9, 1, 0 }
  0x14   : > { %s1115_s27 = scalar_select %p37_p7, %s1010_s14, %s39_s21  }
  0x15   : > { %p1117_p11 = por %p136_p10, %p52_p3  ;;  %p143_p13 = scmp.lt.s32.totalorder %s1022_s17, 3 }
  0x16   : > { %s1024_s30 = smov [#allocation5]   ;;  %s880_s8 = scalar_lea.hbm %s1341_s1, 8192 }
  0x17   : > { %s1352_s28 = scalar_select %p1117_p11, 1, 0 }
  0x18   : > { %p1123_p0 = pnand %p638_p12, %p143_p13  ;;  %s158_s4 = sshll.u32 %s1024_s30, 4  ;;  %s159_s4 = int_to_ptr.vmem [resolvable:$true] %s158_s4 }
  0x19   : > { %p881_p3 = scmp.ne.s32.totalorder %s1341_s1, %s880_s8  ;;  %p887_p12 = scmp.lt.u32.totalorder %s880_s8, %s1341_s1 }
  0x1a   : > { %s1353_s29 = scalar_select %p1123_p0, 1, 0 }
  0x1b   : > { %p782_p1 = pneg %p1123_p0 }
  0x1d   : > { %p1131_p2 = pnand %p782_p1, %p1098_p5 }
  0x1f   : > { %p882_p6 = pneg %p1131_p2 }
  0x21   : > { %p883_p7 = pnand %p882_p6, %p881_p3 }
  0x23   : > { %p884_p10 = pneg %p883_p7 }
  0x25   : > { %p889_p13 = pnand %p887_p12, %p884_p10 }
  0x27   : > { %892 = shalt.err (!%p889_p13)
}
  0x28   : > { %s893_s19 = scalar_lea.vmem %s159_s4, 8192  ;;  %p901_p5 = scmp.lt.s32.totalorder %s159_s4, %s159_s4 }
  0x29   : > { %p894_p1 = scmp.ne.s32.totalorder %s159_s4, %s893_s19  ;;  %p902_p8 = scmp.lt.s32.totalorder %s893_s19, %s893_s19 }
  0x2b   : > { %p896_p11 = pnand %p894_p1, %p882_p6  ;;  %p903_p0 = por %p902_p8, %p901_p5 }
  0x2d   : > { %p897_p9 = pneg %p896_p11 }
  0x2f   : > { %p904_p4 = pnand %p903_p0, %p897_p9 }
  0x31   : > { %907 = shalt.err (!%p904_p4)
}
  0x32   : > { %s1025_s21 = smov 256   ;;  %s1026_s24 = smov 16  }
  0x33   : > { %785 = dma.hbm_to_vmem [thread:$0]  (!%p1131_p2), %s1341_s1, 8192, %s159_s4, [#allocation6], %s1025_s21, %s1025_s21, %s1026_s24  }
  0x34   : > { %p641_p3 = scmp.ge.s32.totalorder %s1022_s17, 2 }
  0x35   : > { %p1355_p11 = scmp.ne.s32.totalorder (!%p641_p3), %s1348_s22, 0 }
  0x36   : > { %176 = sbr.rel (%p641_p3) target bundleno = 96 (0x60), region = 24 }
  0x3d   : > { %179 = sbr.rel (!%p1355_p11) target bundleno = 96 (0x60), region = 28  ;;  %s180_s7 = sand.u32 (%p1355_p11), 1, %s1010_s14  }
  0x3e   : > { %s643_s8 = sshll.u32 (%p1355_p11), %s1018_s16, 2  ;;  %s642_s9 = sshll.u32 (%p1355_p11), %s180_s7, 6 }
  0x3f   : > { %s186_s10 = ssub.s32 (%p1355_p11), 7, %s643_s8  ;;  %s1161_s11 = scalar_lea.sflag (%p1355_p11), [#allocation3], %s180_s7 }
  0x40   : > { %p187_p4 = scmp.lt.s32.totalorder (%p1355_p11), %s186_s10, 4  ;;  %s184_s18 = scalar_lea.vmem (%p1355_p11), [#allocation2], %s642_s9 }
  0x44   : > { %s1369_s10 = smov (!%p187_p4, %s186_s10), 4 }
  0x45   : > { %s1158_s5 = sshll.u32 %s1369_s10, 8 }
  0x46   : > { %s192_s4 = ssub.s32 1024, %s1158_s5 }
  0x47   : > { %193 = vsyncadd %s1161_s11, %s192_s4  ;;  %p646_p5 = scmp.ne.s32.totalorder %s1158_s5, 0  ;;  %s676_s22 = sshll.u32 %s1018_s16, 10 }
  0x48   : > { %s1169_s24 = scalar_lea.hbm %s1340_s0, %s676_s22  ;;  %s199_s30 = sshll.u32 %s184_s18, 4  ;;  %s1171_s30 = int_to_ptr.vmem [resolvable:$true] %s199_s30 }
  0x49   : > { %s908_s6 = scalar_lea.hbm %s1169_s24, %s1158_s5  ;;  %s912_s9 = scalar_lea.hbm %s1340_s0, 1792 }
  0x4a   : > { %p909_p8 = scmp.ne.s32.totalorder %s1169_s24, %s908_s6  ;;  %p913_p2 = scmp.lt.u32.totalorder %s1169_s24, %s1340_s0 }
  0x4b   : > { %p914_p6 = scmp.lt.u32.totalorder %s912_s9, %s908_s6  ;;  %p916_p10 = scmp.lt.u32.totalorder %s908_s6, %s1169_s24 }
  0x4c   : > { %p910_p9 = pnand %p909_p8, %p646_p5 }
  0x4d   : > { %p915_p7 = por %p914_p6, %p913_p2 }
  0x4e   : > { %p911_p0 = pneg %p910_p9 }
  0x4f   : > { %p917_p12 = por %p916_p10, %p915_p7 }
  0x51   : > { %p918_p13 = pnand %p917_p12, %p911_p0 }
  0x53   : > { %921 = shalt.err (!%p918_p13)
}
  0x54   : > { %s922_s18 = scalar_lea.vmem %s1171_s30, %s1158_s5  ;;  %s1027_s22 = smov [#allocation2]  }
  0x55   : > { %p923_p1 = scmp.ne.s32.totalorder %s1171_s30, %s922_s18  ;;  %s926_s19 = sshll.u32 %s1027_s22, 4  ;;  %s927_s19 = int_to_ptr.vmem [resolvable:$false] %s926_s19 }
  0x56   : > { %s928_s21 = scalar_lea.vmem %s927_s19, 2048  ;;  %p929_p8 = scmp.lt.s32.totalorder %s1171_s30, %s927_s19 }
  0x57   : > { %p924_p11 = pnand %p923_p1, %p646_p5  ;;  %p930_p9 = scmp.lt.s32.totalorder %s928_s21, %s922_s18 }
  0x59   : > { %p925_p4 = pneg %p924_p11  ;;  %p931_p2 = por %p930_p9, %p929_p8 }
  0x5b   : > { %p932_p6 = pnand %p931_p2, %p925_p4 }
  0x5d   : > { %935 = shalt.err (!%p932_p6)
}
  0x5e   : > { %s1028_s6 = smov 256   ;;  %s1029_s7 = smov 16  }
  0x5f   : > { %205 = dma.hbm_to_vmem [thread:$0]  (%p646_p5), %s1169_s24, %s1158_s5, %s1171_s30, %s1161_s11, %s1028_s6, %s1028_s6, %s1029_s7  }
  0x60 PF: > { %p1356_p0 = scmp.ne.s32.totalorder %s1353_s29, 0 }
  0x61   : > { %s1201_s8 = sand.u32 (!%p1356_p0), 1, %s1006_s13   ;;  %p1357_p7 = scmp.ne.s32.totalorder (!%p1356_p0), %s1350_s25, 0 }
  0x62   : > { %211 = sbr.rel (%p1356_p0) target bundleno = 454 (0x1c6), region = 32  ;;  %s652_s9 = sshll.u32 (!%p1356_p0), %s1201_s8, 6 }
  0x63   : > { %s214_s10 = scalar_lea.sflag (!%p1356_p0), [#allocation3], %s1201_s8  ;;  %s1207_s4 = scalar_lea.vmem (!%p1356_p0), [#allocation2], %s652_s9 }
  0x69   : > { %989 = dma.done.wait (%p1357_p7), %s214_s10, 1024  }
  0x6a   : > { %991 = vsyncadd (%p1357_p7), %s214_s10, 4294966272  ;;  %p1358_p5 = scmp.ne.s32.totalorder %s1349_s23, 0 }
  0x6c   : > { %993 = dma.done.wait (%p1358_p5), [#allocation6], 8192  }
  0x6d   : > { %995 = vsyncadd (%p1358_p5), [#allocation6], 4294959104  ;;  %v276_v0 = vld [vmem:[#allocation5 + $0x8] sm:$0xff]  ;;  %v278_v1 = vld [vmem:[#allocation5 + $0x18] sm:$0xff]  ;;  %s1256_s29 = scalar_lea.vmem [#allocation7], %s652_s9  ;;  %s505_s5 = scalar_lea.sflag [#allocation4], %s1201_s8 }
  0x6e   : > { %v275_v2 = vld [vmem:[#allocation5] sm:$0xff]  ;;  %v680_v3 = vpack.c.bf16 %v278_v1, %v276_v0  ;;  %v277_v4 = vld [vmem:[#allocation5 + $0x10] sm:$0xff]  ;;  %v280_v5 = vld [vmem:[#allocation5 + $0x28] sm:$0xff]  ;;  %p1359_p10 = scmp.ne.s32.totalorder %s1351_s26, 0 }
  0x6f   : > { %v282_v6 = vld [vmem:[#allocation5 + $0x38] sm:$0xff]  ;;  %v682_v7 = vpack.c.bf16 %v277_v4, %v275_v2  ;;  %v279_v9 = vld [vmem:[#allocation5 + $0x20] sm:$0xff]  ;;  %v281_v10 = vld [vmem:[#allocation5 + $0x30] sm:$0xff]  ;;  %s664_s11 = sshll.u32 (%p1359_p10), %s1014_s15, 2 }
  0x70   : > { %v684_v8 = vpack.c.bf16 %v282_v6, %v280_v5  ;;  %v284_v11 = vld [vmem:[#allocation5 + $0x48] sm:$0xff]  ;;  %681 = vmatprep.subr.bf16.mxu0 %v680_v3  ;;  %744 = vmatprep.subr.bf16.mxu1 %v680_v3  ;;  %v286_v12 = vld [vmem:[#allocation5 + $0x58] sm:$0xff]  ;;  %v686_v13 = vpack.c.bf16 %v281_v10, %v279_v9  ;;  %v283_v15 = vld [vmem:[#allocation5 + $0x40] sm:$0xff]  ;;  %s514_s24 = ssub.s32 (%p1359_p10), 7, %s664_s11 }
  0x71   : > { %683 = vmatpush1.bf16.msra.mxu0 %v682_v7  ;;  %760 = vmatpush1.bf16.msra.mxu1 %v682_v7  ;;  %v688_v14 = vpack.c.bf16 %v286_v12, %v284_v11  ;;  %v285_v16 = vld [vmem:[#allocation5 + $0x50] sm:$0xff]  ;;  %v288_v17 = vld [vmem:[#allocation5 + $0x68] sm:$0xff]  ;;  %v290_v18 = vld [vmem:[#allocation5 + $0x78] sm:$0xff]  ;;  %p515_p12 = scmp.lt.s32.totalorder (%p1359_p10), %s514_s24, 4 }
  0x72   : > { %685 = vmatprep.subr.bf16.mxu0 %v684_v8  ;;  %745 = vmatprep.subr.bf16.mxu1 %v684_v8  ;;  %v690_v19 = vpack.c.bf16 %v285_v16, %v283_v15  ;;  %v692_v20 = vpack.c.bf16 %v290_v18, %v288_v17  ;;  %v287_v21 = vld [vmem:[#allocation5 + $0x60] sm:$0xff]  ;;  %v289_v22 = vld [vmem:[#allocation5 + $0x70] sm:$0xff]  ;;  %v292_v23 = vld [vmem:[#allocation5 + $0x88] sm:$0xff] }
  0x73   : > { %v294_v24 = vld [vmem:[#allocation5 + $0x98] sm:$0xff]  ;;  %v694_v25 = vpack.c.bf16 %v289_v22, %v287_v21  ;;  %v291_v27 = vld [vmem:[#allocation5 + $0x80] sm:$0xff]  ;;  %v293_v28 = vld [vmem:[#allocation5 + $0x90] sm:$0xff] }
  0x74   : > { %v696_v26 = vpack.c.bf16 %v294_v24, %v292_v23  ;;  %v296_v29 = vld [vmem:[#allocation5 + $0xa8] sm:$0xff]  ;;  %v298_v30 = vld [vmem:[#allocation5 + $0xb8] sm:$0xff]  ;;  %v698_v31 = vpack.c.bf16 %v293_v28, %v291_v27  ;;  %v295_v33 = vld [vmem:[#allocation5 + $0xa0] sm:$0xff] }
  0x75   : > { %687 = vmatpush1.bf16.msra.mxu0 %v686_v13  ;;  %761 = vmatpush1.bf16.msra.mxu1 %v686_v13  ;;  %v700_v32 = vpack.c.bf16 %v298_v30, %v296_v29  ;;  %v297_v34 = vld [vmem:[#allocation5 + $0xb0] sm:$0xff]  ;;  %v300_v35 = vld [vmem:[#allocation5 + $0xc8] sm:$0xff]  ;;  %v302_v36 = vld [vmem:[#allocation5 + $0xd8] sm:$0xff] }
  0x76   : > { %689 = vmatprep.subr.bf16.mxu0 %v688_v14  ;;  %746 = vmatprep.subr.bf16.mxu1 %v688_v14  ;;  %v702_v37 = vpack.c.bf16 %v297_v34, %v295_v33  ;;  %v299_v38 = vld [vmem:[#allocation5 + $0xc0] sm:$0xff]  ;;  %v704_v39 = vpack.c.bf16 %v302_v36, %v300_v35  ;;  %v301_v40 = vld [vmem:[#allocation5 + $0xd0] sm:$0xff]  ;;  %v1218_v41 = vld [vmem:[%s1207_s4 + $0x8] sm:$0xff] }
  0x77   : > { %v1221_v42 = vld [vmem:[%s1207_s4 + $0x28] sm:$0xff]  ;;  %v306_v44 = vld [vmem:[#allocation5 + $0xf8] sm:$0xff]  ;;  %415 = vmatprep.mubr.f32.mxu0 %v1218_v41  ;;  %v706_v45 = vpack.c.bf16 %v301_v40, %v299_v38  ;;  %v303_v47 = vld [vmem:[#allocation5 + $0xe0] sm:$0xff]  ;;  %v341_v40 = vlaneseq }
  0x78   : > { %v304_v43 = vld [vmem:[#allocation5 + $0xe8] sm:$0xff]  ;;  %427 = vmatprep.mubr.f32.mxu1 %v1221_v42  ;;  %v305_v48 = vld [vmem:[#allocation5 + $0xf0] sm:$0xff]  ;;  %v310_v50 = vld [vmem:[#allocation5 + $0x118] sm:$0xff] }
  0x79   : > { %691 = vmatpush1.bf16.msra.mxu0 %v690_v19  ;;  %762 = vmatpush1.bf16.msra.mxu1 %v690_v19  ;;  %v708_v46 = vpack.c.bf16 %v306_v44, %v304_v43  ;;  %v308_v49 = vld [vmem:[#allocation5 + $0x108] sm:$0xff]  ;;  %v710_v51 = vpack.c.bf16 %v305_v48, %v303_v47  ;;  %v307_v53 = vld [vmem:[#allocation5 + $0x100] sm:$0xff]  ;;  %v309_v54 = vld [vmem:[#allocation5 + $0x110] sm:$0xff]  ;;  %v342_v43 = vshrl.u32 %v341_v40, 7 }
  0x7a   : > { %693 = vmatprep.subr.bf16.mxu0 %v692_v20  ;;  %747 = vmatprep.subr.bf16.mxu1 %v692_v20  ;;  %v712_v52 = vpack.c.bf16 %v310_v50, %v308_v49  ;;  %v312_v55 = vld [vmem:[#allocation5 + $0x128] sm:$0xff]  ;;  %v314_v56 = vld [vmem:[#allocation5 + $0x138] sm:$0xff]  ;;  %v714_v57 = vpack.c.bf16 %v309_v54, %v307_v53  ;;  %v311_v59 = vld [vmem:[#allocation5 + $0x120] sm:$0xff] }
  0x7b   : > { %v716_v58 = vpack.c.bf16 %v314_v56, %v312_v55  ;;  %v313_v60 = vld [vmem:[#allocation5 + $0x130] sm:$0xff]  ;;  %v316_v61 = vld [vmem:[#allocation5 + $0x148] sm:$0xff]  ;;  %v318_v62 = vld [vmem:[#allocation5 + $0x158] sm:$0xff]  ;;  %v343_v44 = vsub.s32 0, %v342_v43 }
  0x7c   : > { %v718_v63 = vpack.c.bf16 %v313_v60, %v311_v59  ;;  %v720_v0 = vpack.c.bf16 %v318_v62, %v316_v61  ;;  %v315_v1 = vld [vmem:[#allocation5 + $0x140] sm:$0xff]  ;;  %v317_v2 = vld [vmem:[#allocation5 + $0x150] sm:$0xff]  ;;  %v320_v3 = vld [vmem:[#allocation5 + $0x168] sm:$0xff] }
  0x7d   : > { %695 = vmatpush1.bf16.msra.mxu0 %v694_v25  ;;  %763 = vmatpush1.bf16.msra.mxu1 %v694_v25  ;;  %v322_v4 = vld [vmem:[#allocation5 + $0x178] sm:$0xff]  ;;  %v722_v5 = vpack.c.bf16 %v317_v2, %v315_v1  ;;  %v319_v7 = vld [vmem:[#allocation5 + $0x160] sm:$0xff]  ;;  %v321_v8 = vld [vmem:[#allocation5 + $0x170] sm:$0xff] }
  0x7e   : > { %697 = vmatprep.subr.bf16.mxu0 %v696_v26  ;;  %748 = vmatprep.subr.bf16.mxu1 %v696_v26  ;;  %v724_v6 = vpack.c.bf16 %v322_v4, %v320_v3  ;;  %v324_v9 = vld [vmem:[#allocation5 + $0x188] sm:$0xff]  ;;  %v326_v10 = vld [vmem:[#allocation5 + $0x198] sm:$0xff]  ;;  %v726_v11 = vpack.c.bf16 %v321_v8, %v319_v7  ;;  %v323_v13 = vld [vmem:[#allocation5 + $0x180] sm:$0xff] }
  0x7f   : > { %v728_v12 = vpack.c.bf16 %v326_v10, %v324_v9  ;;  %v325_v14 = vld [vmem:[#allocation5 + $0x190] sm:$0xff]  ;;  %v328_v15 = vld [vmem:[#allocation5 + $0x1a8] sm:$0xff]  ;;  %v330_v16 = vld [vmem:[#allocation5 + $0x1b8] sm:$0xff] }
  0x80   : > { %v730_v17 = vpack.c.bf16 %v325_v14, %v323_v13  ;;  %v732_v18 = vpack.c.bf16 %v330_v16, %v328_v15  ;;  %v327_v19 = vld [vmem:[#allocation5 + $0x1a0] sm:$0xff]  ;;  %v329_v20 = vld [vmem:[#allocation5 + $0x1b0] sm:$0xff]  ;;  %v332_v21 = vld [vmem:[#allocation5 + $0x1c8] sm:$0xff] }
  0x81   : > { %699 = vmatpush1.bf16.msra.mxu0 %v698_v31  ;;  %764 = vmatpush1.bf16.msra.mxu1 %v698_v31  ;;  %v334_v22 = vld [vmem:[#allocation5 + $0x1d8] sm:$0xff]  ;;  %v734_v23 = vpack.c.bf16 %v329_v20, %v327_v19  ;;  %v331_v25 = vld [vmem:[#allocation5 + $0x1c0] sm:$0xff]  ;;  %v333_v26 = vld [vmem:[#allocation5 + $0x1d0] sm:$0xff] }
  0x82   : > { %701 = vmatprep.subr.bf16.mxu0 %v700_v32  ;;  %749 = vmatprep.subr.bf16.mxu1 %v700_v32  ;;  %v736_v24 = vpack.c.bf16 %v334_v22, %v332_v21  ;;  %v336_v27 = vld [vmem:[#allocation5 + $0x1e8] sm:$0xff]  ;;  %v338_v28 = vld [vmem:[#allocation5 + $0x1f8] sm:$0xff]  ;;  %v738_v29 = vpack.c.bf16 %v333_v26, %v331_v25  ;;  %v335_v31 = vld [vmem:[#allocation5 + $0x1e0] sm:$0xff] }
  0x83   : > { %v740_v30 = vpack.c.bf16 %v338_v28, %v336_v27  ;;  %v337_v32 = vld [vmem:[#allocation5 + $0x1f0] sm:$0xff]  ;;  %v1226_v34 = vld [vmem:[%s1207_s4] sm:$0xff]  ;;  %v1232_v36 = vld [vmem:[%s1207_s4 + $0x18] sm:$0xff] }
  0x84   : > { %v742_v33 = vpack.c.bf16 %v337_v32, %v335_v31  ;;  %v1229_v35 = vld [vmem:[%s1207_s4 + $0x20] sm:$0xff]  ;;  %v1242_v38 = vld [vmem:[%s1207_s4 + $0x10] sm:$0xff] }
  0x85   : > { %703 = vmatpush1.bf16.msra.mxu0 %v702_v37  ;;  %765 = vmatpush1.bf16.msra.mxu1 %v702_v37  ;;  %v1235_v37 = vld [vmem:[%s1207_s4 + $0x38] sm:$0xff] }
  0x86   : > { %705 = vmatprep.subr.bf16.mxu0 %v704_v39  ;;  %750 = vmatprep.subr.bf16.mxu1 %v704_v39  ;;  %v1245_v39 = vld [vmem:[%s1207_s4 + $0x30] sm:$0xff] }
  0x89   : > { %707 = vmatpush1.bf16.msra.mxu0 %v706_v45  ;;  %766 = vmatpush1.bf16.msra.mxu1 %v706_v45  ;;  %v339_v45 = vld [vmem:[%s1342_s2] sm:$0x3] }
  0x8a   : > { %709 = vmatprep.subr.bf16.mxu0 %v708_v46  ;;  %751 = vmatprep.subr.bf16.mxu1 %v708_v46  ;;  %v347_v46 = vsub.s32 1, %v342_v43  ;;  %v344_v47 = vrot.slane %v339_v45, %v343_v44 }
  0x8c   : > { %v348_v48 = vrot.slane %v339_v45, %v347_v46 }
  0x8d   : > { %711 = vmatpush1.bf16.msra.mxu0 %v710_v51  ;;  %767 = vmatpush1.bf16.msra.mxu1 %v710_v51 }
  0x8e   : > { %713 = vmatprep.subr.bf16.mxu0 %v712_v52  ;;  %752 = vmatprep.subr.bf16.mxu1 %v712_v52 }
  0x91   : > { %715 = vmatpush1.bf16.msra.mxu0 %v714_v57  ;;  %768 = vmatpush1.bf16.msra.mxu1 %v714_v57 }
  0x92   : > { %717 = vmatprep.subr.bf16.mxu0 %v716_v58  ;;  %753 = vmatprep.subr.bf16.mxu1 %v716_v58 }
  0x95   : > { %719 = vmatpush1.bf16.msra.mxu0 %v718_v63  ;;  %769 = vmatpush1.bf16.msra.mxu1 %v718_v63 }
  0x96   : > { %721 = vmatprep.subr.bf16.mxu0 %v720_v0  ;;  %754 = vmatprep.subr.bf16.mxu1 %v720_v0 }
  0x99   : > { %723 = vmatpush1.bf16.msra.mxu0 %v722_v5  ;;  %770 = vmatpush1.bf16.msra.mxu1 %v722_v5 }
  0x9a   : > { %725 = vmatprep.subr.bf16.mxu0 %v724_v6  ;;  %755 = vmatprep.subr.bf16.mxu1 %v724_v6 }
  0x9d   : > { %727 = vmatpush1.bf16.msra.mxu0 %v726_v11  ;;  %771 = vmatpush1.bf16.msra.mxu1 %v726_v11 }
  0x9e   : > { %729 = vmatprep.subr.bf16.mxu0 %v728_v12  ;;  %756 = vmatprep.subr.bf16.mxu1 %v728_v12 }
  0xa1   : > { %731 = vmatpush1.bf16.msra.mxu0 %v730_v17  ;;  %772 = vmatpush1.bf16.msra.mxu1 %v730_v17 }
  0xa2   : > { %733 = vmatprep.subr.bf16.mxu0 %v732_v18  ;;  %757 = vmatprep.subr.bf16.mxu1 %v732_v18 }
  0xa5   : > { %735 = vmatpush1.bf16.msra.mxu0 %v734_v23  ;;  %773 = vmatpush1.bf16.msra.mxu1 %v734_v23 }
  0xa6   : > { %737 = vmatprep.subr.bf16.mxu0 %v736_v24  ;;  %758 = vmatprep.subr.bf16.mxu1 %v736_v24 }
  0xa9   : > { %739 = vmatpush1.bf16.msra.mxu0 %v738_v29  ;;  %774 = vmatpush1.bf16.msra.mxu1 %v738_v29 }
  0xaa   : > { %741 = vmatprep.subr.bf16.mxu0 %v740_v30  ;;  %759 = vmatprep.subr.bf16.mxu1 %v740_v30 }
  0xad   : > { %743 = vmatpush1.bf16.msra.mxu0 %v742_v33  ;;  %775 = vmatpush1.bf16.msra.mxu1 %v742_v33 }
  0xb0   : > { %416 = vmatmul.mubr.f32.vlgmr.msra.gmra.mrb[0].mxu0 %v1226_v34  ;;  %428 = vmatmul.mubr.f32.vlgmr.msra.gmra.mrb[0].mxu1 %v1229_v35 }
  0xb1   : > { %421 = vmatprep.mubr.f32.mxu0 %v1232_v36  ;;  %433 = vmatprep.mubr.f32.mxu1 %v1235_v37 }
  0xb4   : > { %422 = vmatmul.mubr.f32.gmra.mrb[2].mxu0 %v1242_v38  ;;  %434 = vmatmul.mubr.f32.gmra.mrb[2].mxu1 %v1245_v39 }
 0x183   : > { %v417_v49 = vpop.f32.mrb[0].mxu0  ;;  %v429_v50 = vpop.f32.mrb[0].mxu1 }
 0x184   : > { %v418_v51 = vadd.f32 %v417_v49, %v344_v47  ;;  %v430_v52 = vadd.f32 %v429_v50, %v344_v47  ;;  %v419_v53 = vpop.f32.mrb[1].mxu0  ;;  %v431_v54 = vpop.f32.mrb[1].mxu1 }
 0x185   : > { %v420_v55 = vadd.f32 %v419_v53, %v348_v48  ;;  %v432_v56 = vadd.f32 %v431_v54, %v348_v48 }
 0x186   : > { %v655_v57 = vmul.f32 -1.442695, %v418_v51  ;;  %v659_v58 = vmul.f32 -1.442695, %v430_v52 }
 0x187   : > { %v656_v59 = vmul.f32 -1.442695, %v420_v55  ;;  %v660_v60 = vmul.f32 -1.442695, %v432_v56  ;;  %v423_v61 = vpop.f32.mrb[2].mxu0  ;;  %v435_v62 = vpop.f32.mrb[2].mxu1 }
 0x188   : > { %848 = vpow2.f32 %v655_v57  ;;  %v424_v63 = vadd.f32 %v423_v61, %v344_v47  ;;  %v436_v0 = vadd.f32 %v435_v62, %v344_v47  ;;  %v425_v1 = vpop.f32.mrb[3].mxu0  ;;  %v437_v2 = vpop.f32.mrb[3].mxu1 }
 0x189   : > { %850 = vpow2.f32 %v659_v58  ;;  %v426_v3 = vadd.f32 %v425_v1, %v348_v48  ;;  %v438_v4 = vadd.f32 %v437_v2, %v348_v48 }
 0x18a   : > { %852 = vpow2.f32 %v656_v59  ;;  %v657_v5 = vmul.f32 -1.442695, %v424_v63  ;;  %v661_v6 = vmul.f32 -1.442695, %v436_v0 }
 0x18b   : > { %854 = vpow2.f32 %v660_v60  ;;  %v658_v7 = vmul.f32 -1.442695, %v426_v3  ;;  %v662_v8 = vmul.f32 -1.442695, %v438_v4 }
 0x18c   : > { %856 = vpow2.f32 %v657_v5 }
 0x18d   : > { %858 = vpow2.f32 %v661_v6 }
 0x18e   : > { %860 = vpow2.f32 %v658_v7 }
 0x18f   : > { %862 = vpow2.f32 %v662_v8 }
 0x192   : > { %v849_v9 = vpop.eup %848 }
 0x193   : > { %v851_v10 = vpop.eup %850  ;;  %v464_v11 = vadd.f32 1.0, %v849_v9 }
 0x194   : > { %v853_v12 = vpop.eup %852  ;;  %v468_v13 = vadd.f32 1.0, %v851_v10 }
 0x195   : > { %v855_v14 = vpop.eup %854  ;;  %864 = vrcp.f32 %v464_v11  ;;  %v465_v15 = vadd.f32 1.0, %v853_v12 }
 0x196   : > { %v857_v16 = vpop.eup %856  ;;  %866 = vrcp.f32 %v468_v13  ;;  %v469_v17 = vadd.f32 1.0, %v855_v14 }
 0x197   : > { %v859_v18 = vpop.eup %858  ;;  %868 = vrcp.f32 %v465_v15  ;;  %v466_v19 = vadd.f32 1.0, %v857_v16 }
 0x198   : > { %v861_v20 = vpop.eup %860  ;;  %870 = vrcp.f32 %v469_v17  ;;  %v470_v21 = vadd.f32 1.0, %v859_v18 }
 0x199   : > { %v863_v22 = vpop.eup %862  ;;  %872 = vrcp.f32 %v466_v19  ;;  %v467_v23 = vadd.f32 1.0, %v861_v20 }
 0x19a   : > { %874 = vrcp.f32 %v470_v21  ;;  %v471_v24 = vadd.f32 1.0, %v863_v22 }
 0x19b   : > { %876 = vrcp.f32 %v467_v23 }
 0x19c   : > { %878 = vrcp.f32 %v471_v24 }
 0x19f   : > { %v865_v25 = vpop.eup %864 }
 0x1a0   : > { %v867_v26 = vpop.eup %866  ;;  %v488_v27 = vmul.f32 %v865_v25, %v1226_v34 }
 0x1a1   : > { %v869_v28 = vpop.eup %868  ;;  %v492_v29 = vmul.f32 %v867_v26, %v1229_v35 }
 0x1a2   : > { %v871_v30 = vpop.eup %870  ;;  %496 = vst [vmem:[%s1256_s29] sm:$0xff] %v488_v27  ;;  %v489_v31 = vmul.f32 %v869_v28, %v1218_v41 }
 0x1a3   : > { %v873_v32 = vpop.eup %872  ;;  %500 = vst [vmem:[%s1256_s29 + $0x20] sm:$0xff] %v492_v29  ;;  %v493_v33 = vmul.f32 %v871_v30, %v1221_v42  ;;  %511 = sbr.rel (!%p1359_p10) target bundleno = 454 (0x1c6), region = 44 }
 0x1a4   : > { %v875_v34 = vpop.eup %874  ;;  %497 = vst [vmem:[%s1256_s29 + $0x8] sm:$0xff] %v489_v31  ;;  %v490_v35 = vmul.f32 %v873_v32, %v1242_v38 }
 0x1a5   : > { %v877_v40 = vpop.eup %876  ;;  %501 = vst [vmem:[%s1256_s29 + $0x28] sm:$0xff] %v493_v33  ;;  %v494_v43 = vmul.f32 %v875_v34, %v1245_v39 }
 0x1a6   : > { %v879_v44 = vpop.eup %878  ;;  %498 = vst [vmem:[%s1256_s29 + $0x10] sm:$0xff] %v490_v35  ;;  %v491_v45 = vmul.f32 %v877_v40, %v1232_v36 }
 0x1a7   : > { %502 = vst [vmem:[%s1256_s29 + $0x30] sm:$0xff] %v494_v43  ;;  %v495_v41 = vmul.f32 %v879_v44, %v1235_v37 }
 0x1a8   : > { %499 = vst [vmem:[%s1256_s29 + $0x18] sm:$0xff] %v491_v45 }
 0x1a9   : > { %503 = vst [vmem:[%s1256_s29 + $0x38] sm:$0xff] %v495_v41 }
 0x1aa   : > { %s1371_s24 = smov (!%p515_p12, %s514_s24), 4 }
 0x1ab   : > { %s1276_s30 = sshll.u32 %s1371_s24, 8 }
 0x1ac   : > { %s520_s18 = ssub.s32 1024, %s1276_s30 }
 0x1ad   : > { %521 = vsyncadd %s505_s5, %s520_s18  ;;  %p667_p13 = scmp.ne.s32.totalorder %s1276_s30, 0  ;;  %s679_s26 = sshll.u32 %s1014_s15, 10 }
 0x1ae   : > { %s1286_s21 = scalar_lea.hbm %s1343_s3, %s679_s26  ;;  %s528_s6 = sshll.u32 %s1256_s29, 4  ;;  %s1289_s6 = int_to_ptr.vmem [resolvable:$true] %s528_s6 }
 0x1af   : > { %s936_s7 = scalar_lea.vmem %s1289_s6, %s1276_s30  ;;  %s1030_s9 = smov [#allocation7]  }
 0x1b0   : > { %p937_p1 = scmp.ne.s32.totalorder %s1289_s6, %s936_s7  ;;  %s940_s10 = sshll.u32 %s1030_s9, 4  ;;  %s941_s10 = int_to_ptr.vmem [resolvable:$false] %s940_s10 }
 0x1b1   : > { %s942_s15 = scalar_lea.vmem %s941_s10, 2048  ;;  %p943_p8 = scmp.lt.s32.totalorder %s1289_s6, %s941_s10 }
 0x1b2   : > { %p938_p11 = pnand %p937_p1, %p667_p13  ;;  %p944_p9 = scmp.lt.s32.totalorder %s942_s15, %s936_s7 }
 0x1b4   : > { %p939_p4 = pneg %p938_p11  ;;  %p945_p2 = por %p944_p9, %p943_p8 }
 0x1b6   : > { %p946_p6 = pnand %p945_p2, %p939_p4 }
 0x1b8   : > { %949 = shalt.err (!%p946_p6)
}
 0x1b9   : > { %s950_s4 = scalar_lea.hbm %s1286_s21, %s1276_s30  ;;  %s954_s29 = scalar_lea.hbm %s1343_s3, 1792 }
 0x1ba   : > { %p951_p0 = scmp.ne.s32.totalorder %s1286_s21, %s950_s4  ;;  %p955_p10 = scmp.lt.u32.totalorder %s1286_s21, %s1343_s3 }
 0x1bb   : > { %p956_p12 = scmp.lt.u32.totalorder %s954_s29, %s950_s4  ;;  %p958_p11 = scmp.lt.u32.totalorder %s950_s4, %s1286_s21 }
 0x1bc   : > { %p952_p7 = pnand %p951_p0, %p667_p13 }
 0x1bd   : > { %p957_p1 = por %p956_p12, %p955_p10 }
 0x1be   : > { %p953_p5 = pneg %p952_p7 }
 0x1bf   : > { %p959_p4 = por %p958_p11, %p957_p1 }
 0x1c1   : > { %p960_p8 = pnand %p959_p4, %p953_p5 }
 0x1c3   : > { %963 = shalt.err (!%p960_p8)
}
 0x1c4   : > { %s1031_s18 = smov 256   ;;  %s1032_s26 = smov 16  }
 0x1c5   : > { %534 = dma.vmem_to_hbm [thread:$0]  (%p667_p13), %s1289_s6, %s1276_s30, %s1286_s21, %s505_s5, %s1031_s18, %s1031_s18, %s1032_s26  }
 0x1c6 PF: > { %s543_s22 = sand.u32 1, %s1002_s12   ;;  %p1360_p9 = scmp.ne.s32.totalorder %s1352_s28, 0 }
 0x1c7   : > { %s544_s19 = scalar_lea.sflag [#allocation4], %s543_s22 }
 0x1c8   : > { %p787_p2 = pnand %p641_p3, %p1360_p9 }
 0x1ca   : > { %997 = dma.done.wait (!%p787_p2), %s544_s19, 1024  }
 0x1cb   : > { %999 = vsyncadd (!%p787_p2), %s544_s19, 4294966272  ;;  %s20_s17 = sadd.s32 1, %s1022_s17   ;;  %s1361_s12 = smov %s1006_s13 }
 0x1cc   : > { %p17_p6 = scmp.ge.s32.totalorder %s20_s17, 4   ;;  %s1362_s13 = smov %s1010_s14 }
 0x1cd   : > { %s1363_s14 = smov %s1115_s27  ;;  %s1364_s15 = smov %s1018_s16 }
 0x1ce   : > { %s1365_s16 = smov %s1367_s20  ;;  %19 = sbr.rel (!%p17_p6) target bundleno = 7 (0x7), region = 85 }
 0x1d5   :  { %549 = vsyncpa [#allocation3], 1 }
 0x1d6   :  { %551 = vsyncpa [#allocation3 + $0x1], 1 }
 0x1d7   :  { %552 = vsyncpa [#allocation6], 1 }
 0x1d8   :  { %553 = vsyncpa [#allocation4], 1 }
 0x1d9   :  { %555 = vsyncpa [#allocation4 + $0x1], 1 }

</bundles_post_ra>
